<compile_context>
chip_gen: v7x
topology: tpu7x:2x2x1
jax: 0.10.0
libtpu: 0.0.40
codegen_flags: <defaults>
</compile_context>

<pallas_src>
import functools

import jax
import jax.numpy as jnp
import numpy as np
from jax import lax
from jax.experimental import pallas as pl
from jax.experimental.pallas import tpu as pltpu

_NEG_BIG = -1e30  # finite "-inf" sentinel; keeps exp(m_prev - m_new) NaN-free


def _nt_xent_kernel(zr_ref, zc_ref, out_ref, m_acc, s_acc, pos_acc, *,
                    num_transforms, batch_size, k_total, tile_r, tile_c,
                    pos_lanes):
    n = num_transforms
    bs = batch_size
    r = pl.program_id(0)
    c = pl.program_id(1)
    last_c = pl.num_programs(1) - 1

    # ---- init flash accumulators at the start of each column sweep
    @pl.when(c == 0)
    def _init():
        m_acc[...] = jnp.full_like(m_acc, _NEG_BIG)
        s_acc[...] = jnp.zeros_like(s_acc)
        pos_acc[...] = jnp.zeros_like(pos_acc)

    # ---- similarity tile straight off the MXU: operands were L2-normalized
    #      and scaled by sqrt(1/temperature) once in the wrapper, so
    #      sim == cos_sim / temperature (bf16 operands, f32 accumulate).
    sim = lax.dot_general(zr_ref[...], zc_ref[...],
                          (((1,), (1,)), ((), ())),
                          preferred_element_type=jnp.float32)        # (TR, TC)

    # ---- masks from 1-D iotas (O(tile) ints, broadcast compares)
    row_g = r * tile_r + lax.broadcasted_iota(jnp.int32, (tile_r, 1), 0)
    col_g = c * tile_c + lax.broadcasted_iota(jnp.int32, (1, tile_c), 1)
    lane = lax.broadcasted_iota(jnp.int32, (1, pos_lanes), 1)
    col_valid = col_g < k_total
    neg_mask = jnp.logical_and(col_valid, (row_g % bs) != (col_g % bs))

    # ---- online (flash-style) log-sum-exp over the negatives
    tile_max = jnp.max(jnp.where(neg_mask, sim, _NEG_BIG), axis=-1, keepdims=True)
    m_prev = m_acc[...]
    m_new = jnp.maximum(m_prev, tile_max)
    alpha = jnp.exp(m_prev - m_new)
    p = jnp.where(neg_mask, jnp.exp(sim - m_new), 0.0)
    s_acc[...] = alpha * s_acc[...] + jnp.sum(p, axis=-1, keepdims=True)
    m_acc[...] = m_new

    # ---- positives: anchor i's m-th positive sits at column (i + m*bs) mod K.
    #      For this row tile those columns form ONE contiguous (mod K) range,
    #      so they intersect at most two column tiles -> scalar-gate the
    #      (TR,TC) extraction with pl.when and skip it everywhere else.
    r0 = r * tile_r
    r1 = jnp.minimum(r0 + tile_r, k_total)
    c0 = c * tile_c
    c1 = jnp.minimum(c0 + tile_c, k_total)
    span = c1 - c0
    for m in range(1, n):
        a0 = (c0 - m * bs) % k_total          # rows hitting this tile start here
        a_end = a0 + span
        seg1 = jnp.logical_and(a0 < r1, jnp.minimum(a_end, k_total) > r0)
        seg2 = jnp.logical_and(a_end > k_total, a_end - k_total > r0)

        @pl.when(jnp.logical_or(seg1, seg2))
        def _extract(m=m):
            pos_col = (row_g + m * bs) % k_total              # (TR, 1)
            hit = col_g == pos_col                            # (TR, TC)
            pos_val = jnp.sum(jnp.where(hit, sim, 0.0), axis=-1, keepdims=True)
            pos_acc[...] += jnp.where(lane == (m - 1), pos_val, 0.0)

    # ---- epilogue: per-anchor CE terms, reduced to a row-tile partial sum
    @pl.when(c == last_c)
    def _finalize():
        row_valid = row_g < k_total                           # (TR, 1)
        neg_lse = m_acc[...] + jnp.log(s_acc[...])            # (TR, 1)
        x = neg_lse - pos_acc[...]                            # (TR, pos_lanes)
        softplus = jnp.maximum(x, 0.0) + jnp.log1p(jnp.exp(-jnp.abs(x)))
        valid = jnp.logical_and(row_valid, lane < (n - 1))
        total = jnp.sum(jnp.where(valid, softplus, 0.0))
        ri = lax.broadcasted_iota(jnp.int32, (8, 128), 0)
        ci = lax.broadcasted_iota(jnp.int32, (8, 128), 1)
        out_ref[...] = jnp.where(jnp.logical_and(ri == 0, ci == 0),
                                 total, jnp.float32(0.0))


def _round_up(x, m):
    return ((x + m - 1) // m) * m


def _select_tiles(k, d, itemsize, pos_lanes):
    """Choose (tile_r, tile_c, vmem_limit_bytes) from K, D, dtype and the chip."""
    k8 = _round_up(k, 8)
    try:  # generation-aware budget: v7x has 64 MiB / TensorCore, v5e/v6e 128 MiB
        vmem_cap = int(getattr(pltpu.get_tpu_info(), "vmem_capacity_bytes",
                               64 * 1024 * 1024))
    except Exception:
        vmem_cap = 64 * 1024 * 1024
    if vmem_cap <= 64 * 1024 * 1024:
        budget, maybe_two_cores = 44 * 1024 * 1024, True    # v7x-class
    else:
        budget, maybe_two_cores = 96 * 1024 * 1024, False   # v5e / v6e, single TC

    def vmem_need(tr, tc):
        operands = 2 * (tr + tc) * d * itemsize   # double-buffered operand windows
        temps = 3 * tr * tc * 4                   # sim / exp / select f32 temps
        scratch = (pos_lanes + 8) * tr * 4        # pos_acc + m/s accumulators
        return operands + temps + scratch

    if k8 <= 256:                 # tiny problem: one tile covers everything
        tile_r = tile_c = k8
    else:
        tile_c = 256              # MXU-width column tile (N dimension)
        cap = min(_round_up(k8, 256), 4096)   # asymmetric: rows as big as fits
        if maybe_two_cores and k8 >= 512:
            # keep >= 2 row tiles so the "parallel" row axis can use both cores
            cap = min(cap, _round_up(-(-k8 // 2), 256))
        tile_r = cap
        while tile_r > 256 and vmem_need(tile_r, tile_c) > budget:
            tile_r -= 256
        while tile_r > 16 and vmem_need(tile_r, tile_c) > budget:
            tile_r = max(16, tile_r // 2)   # pathological huge-D fallback
            tile_c = tile_r
        # TODO(synk): for very large D the right fix is a third grid axis that
        # chunks the contraction dim into a (tile_r, tile_c) f32 accumulator;
        # not needed for typical SimCLR embedding sizes.
        # Rebalance so the last row tile is not mostly padding.
        num_r = -(-k // tile_r)
        tile_r = min(tile_r, _round_up(-(-k // num_r), 16))

    vmem_limit = min(budget + (4 << 20), vmem_cap - (8 << 20))
    return tile_r, tile_c, int(vmem_limit)


def cl_block_loss(z, *, temperature, num_transforms, batch_size,
                  mxu_dtype=jnp.bfloat16):
    """Forward pass of ClBlockLoss. z has shape (N, BS, *features)."""
    n, bs = z.shape[:2]
    assert n == num_transforms and bs == batch_size
    assert n >= 2, "need at least two transforms (otherwise there are no positives)"
    z2d = z.reshape(n * bs, -1)
    k, d = z2d.shape

    # One-time L2 normalization with sqrt(1/T) folded in, so the in-kernel dot
    # of two such rows is exactly cos_sim / temperature.  Stored in MXU dtype.
    zf = z2d.astype(jnp.float32)
    inv_norm = lax.rsqrt(jnp.maximum(jnp.sum(zf * zf, axis=-1, keepdims=True),
                                     jnp.float32(1e-16)))
    zn = (zf * (inv_norm * float(np.sqrt(1.0 / temperature)))).astype(mxu_dtype)

    pos_lanes = max(128, _round_up(n - 1, 128))
    itemsize = jnp.dtype(mxu_dtype).itemsize
    tile_r, tile_c, vmem_limit = _select_tiles(k, d, itemsize, pos_lanes)
    num_r = -(-k // tile_r)
    num_c = -(-k // tile_c)

    # Zero-pad to the tiled extent: out-of-range reads become deterministic
    # zeros (and are additionally masked out inside the kernel).
    k_pad = max(num_r * tile_r, num_c * tile_c)
    if k_pad > k:
        zn = jnp.pad(zn, ((0, k_pad - k), (0, 0)))

    kernel = functools.partial(
        _nt_xent_kernel,
        num_transforms=n, batch_size=bs, k_total=k,
        tile_r=tile_r, tile_c=tile_c, pos_lanes=pos_lanes)

    grid_spec = pltpu.PrefetchScalarGridSpec(
        num_scalar_prefetch=0,
        grid=(num_r, num_c),
        in_specs=[pl.BlockSpec((tile_r, d), lambda i, j: (i, 0)),
                  pl.BlockSpec((tile_c, d), lambda i, j: (j, 0))],
        out_specs=pl.BlockSpec((8, 128), lambda i, j: (i, 0)),
        scratch_shapes=[pltpu.VMEM((tile_r, 1), jnp.float32),          # running max
                        pltpu.VMEM((tile_r, 1), jnp.float32),          # running sum-exp
                        pltpu.VMEM((tile_r, pos_lanes), jnp.float32)])  # positives

    cost = pl.CostEstimate(
        flops=int(2 * k_pad * k_pad * d + 8 * k_pad * k_pad),
        transcendentals=int(k_pad * k_pad + 4 * k_pad),
        bytes_accessed=int((num_r + 1) * k_pad * d * itemsize
                           + num_r * 8 * 128 * 4))

    partials = pl.pallas_call(
        kernel,
        out_shape=jax.ShapeDtypeStruct((num_r * 8, 128), jnp.float32),
        grid_spec=grid_spec,
        compiler_params=pltpu.CompilerParams(
            dimension_semantics=("parallel", "arbitrary"),
            vmem_limit_bytes=int(vmem_limit)),
        cost_estimate=cost,
    )(zn, zn)

    kpos = n * (n - 1) * bs
    return jnp.sum(partials) / jnp.float32(kpos)


def _reference_loss(z_np, temperature, n, bs):
    """Pure numpy re-implementation of the PyTorch forward (for verification)."""
    z = np.asarray(z_np, np.float64).reshape(n * bs, -1)
    k = n * bs
    norms = np.linalg.norm(z, axis=1)
    denom = np.maximum(np.outer(norms, norms), 1e-8)
    sim = (z @ z.T) / denom / temperature
    total = 0.0
    count = 0
    for i in range(k):
        negs = [sim[i, j] for j in range(k) if j != i and (j - i) % bs != 0]
        for j in range(k):
            if j != i and (j - i) % bs == 0:
                logits = np.array([sim[i, j]] + negs)
                mx = logits.max()
                lse = mx + np.log(np.sum(np.exp(logits - mx)))
                total += lse - logits[0]
                count += 1
    return total / count


if __name__ == "__main__":
    # hyperparams stand-in (module only reads .temperature)
    temperature = 0.5
    num_transforms = 2
    batch_size = 4

    key = jax.random.PRNGKey(0)
    # z: (N, BS, C, H) -> flattened feature dim D = 4 * 8 = 32
    z = jax.random.normal(key, (num_transforms, batch_size, 4, 8),
                          dtype=jnp.float32)

    loss = cl_block_loss(
        z,
        temperature=temperature,
        num_transforms=num_transforms,
        batch_size=batch_size,
    )
    loss = jax.block_until_ready(loss)

    ref = _reference_loss(np.asarray(z), temperature, num_transforms, batch_size)
    # bf16 MXU operands (f32 accumulate) -> loosened tolerance on the scalar loss
    np.testing.assert_allclose(float(loss), ref, rtol=2e-2, atol=2e-3)

    # degenerate batch_size == 1 (no negatives): loss must be exactly 0
    z1 = jax.random.normal(jax.random.PRNGKey(1), (3, 1, 16), dtype=jnp.float32)
    loss1 = jax.block_until_ready(
        cl_block_loss(z1, temperature=temperature,
                      num_transforms=3, batch_size=1))
    assert abs(float(loss1)) < 1e-6, float(loss1)

    print("KERNEL_OK")
</pallas_src>

<mosaic_0001>
module attributes {stable_mosaic.version = 11 : i64} {
  func.func @_nt_xent_kernel(%arg0: i32, %arg1: i32, %arg2: memref<8x32xbf16, #tpu.memory_space<vmem>>, %arg3: memref<8x32xbf16, #tpu.memory_space<vmem>>, %arg4: memref<8x128xf32, #tpu.memory_space<vmem>>, %arg5: memref<8x1xf32, #tpu.memory_space<vmem>>, %arg6: memref<8x1xf32, #tpu.memory_space<vmem>>, %arg7: memref<8x128xf32, #tpu.memory_space<vmem>>) attributes {dimension_semantics = [#tpu.dimension_semantics<parallel>, #tpu.dimension_semantics<arbitrary>], iteration_bounds = array<i64: 1, 1>, scalar_prefetch = 0 : i64, scratch_operands = 3 : i64, tpu.core_type = #tpu.core_type<tc>, window_params = [{transform_indices = @transform_0, window_bounds = array<i64: 8, 32>}, {transform_indices = @transform_1, window_bounds = array<i64: 8, 32>}, {transform_indices = @transform_2, window_bounds = array<i64: 8, 128>}]} {
    %c0_i32 = arith.constant 0 : i32
    %0 = arith.cmpi eq, %arg1, %c0_i32 : i32
    %1 = arith.extui %0 : i1 to i32
    %c0_i32_0 = arith.constant 0 : i32
    %2 = arith.cmpi ne, %1, %c0_i32_0 : i32
    scf.if %2 {
      %cst_47 = arith.constant -1.000000e+30 : f32
      %107 = vector.broadcast %cst_47 : f32 to vector<8x1xf32>
      %c0_48 = arith.constant 0 : index
      %c0_49 = arith.constant 0 : index
      %108 = vector.load %arg5[%c0_48, %c0_49] : memref<8x1xf32, #tpu.memory_space<vmem>>, vector<8x1xf32>
      tpu.vector_store %arg5[%c0_48, %c0_49], %107 {strides = array<i32>} : memref<8x1xf32, #tpu.memory_space<vmem>>, vector<8x1xf32>,
      %cst_50 = arith.constant 0.000000e+00 : f32
      %109 = vector.broadcast %cst_50 : f32 to vector<8x1xf32>
      %c0_51 = arith.constant 0 : index
      %c0_52 = arith.constant 0 : index
      %110 = vector.load %arg6[%c0_51, %c0_52] : memref<8x1xf32, #tpu.memory_space<vmem>>, vector<8x1xf32>
      tpu.vector_store %arg6[%c0_51, %c0_52], %109 {strides = array<i32>} : memref<8x1xf32, #tpu.memory_space<vmem>>, vector<8x1xf32>,
      %cst_53 = arith.constant 0.000000e+00 : f32
      %111 = vector.broadcast %cst_53 : f32 to vector<8x128xf32>
      %c0_54 = arith.constant 0 : index
      %c0_55 = arith.constant 0 : index
      %112 = vector.load %arg7[%c0_54, %c0_55] : memref<8x128xf32, #tpu.memory_space<vmem>>, vector<8x128xf32>
      tpu.vector_store %arg7[%c0_54, %c0_55], %111 {strides = array<i32>} : memref<8x128xf32, #tpu.memory_space<vmem>>, vector<8x128xf32>,
    } else {
    }
    %c0 = arith.constant 0 : index
    %c0_1 = arith.constant 0 : index
    %3 = vector.load %arg2[%c0, %c0_1] : memref<8x32xbf16, #tpu.memory_space<vmem>>, vector<8x32xbf16>
    %c0_2 = arith.constant 0 : index
    %c0_3 = arith.constant 0 : index
    %4 = vector.load %arg3[%c0_2, %c0_3] : memref<8x32xbf16, #tpu.memory_space<vmem>>, vector<8x32xbf16>
    %cst = arith.constant dense<0.000000e+00> : vector<8x8xf32>
    %5 = tpu.matmul %3, %4, %cst {dimension_numbers = #tpu.dot_dimension_numbers<[1], [1], [0], [0], [0, 0, 1, 0], [], []>} : vector<8x32xbf16>, vector<8x32xbf16>, vector<8x8xf32> -> vector<8x8xf32>
    %c8_i32 = arith.constant 8 : i32
    %6 = arith.muli %arg0, %c8_i32 : i32
    %7 = tpu.iota {dimensions = array<i32: 0>} : vector<8x1xi32>
    %8 = vector.broadcast %6 : i32 to vector<8x1xi32>
    %9 = arith.addi %8, %7 : vector<8x1xi32>
    %c8_i32_4 = arith.constant 8 : i32
    %10 = arith.muli %arg1, %c8_i32_4 : i32
    %11 = tpu.iota {dimensions = array<i32: 1>} : vector<1x8xi32>
    %12 = vector.broadcast %10 : i32 to vector<1x8xi32>
    %13 = arith.addi %12, %11 : vector<1x8xi32>
    %14 = tpu.iota {dimensions = array<i32: 1>} : vector<1x128xi32>
    %c8_i32_5 = arith.constant 8 : i32
    %15 = vector.broadcast %c8_i32_5 : i32 to vector<1x8xi32>
    %16 = arith.cmpi slt, %13, %15 : vector<1x8xi32>
    %c4_i32 = arith.constant 4 : i32
    %c0_i32_6 = arith.constant 0 : i32
    %17 = arith.cmpi eq, %c4_i32, %c0_i32_6 : i32
    %c1_i32 = arith.constant 1 : i32
    %18 = arith.select %17, %c1_i32, %c4_i32 : i32
    %19 = vector.broadcast %18 : i32 to vector<8x1xi32>
    %20 = arith.remsi %9, %19 : vector<8x1xi32>
    %c0_i32_7 = arith.constant 0 : i32
    %21 = vector.broadcast %c0_i32_7 : i32 to vector<8x1xi32>
    %22 = arith.cmpi ne, %20, %21 : vector<8x1xi32>
    %c0_i32_8 = arith.constant 0 : i32
    %23 = vector.broadcast %c0_i32_8 : i32 to vector<8x1xi32>
    %24 = arith.cmpi slt, %20, %23 : vector<8x1xi32>
    %c0_i32_9 = arith.constant 0 : i32
    %25 = arith.cmpi slt, %18, %c0_i32_9 : i32
    %26 = vector.broadcast %25 : i1 to vector<8x1xi1>
    %27 = vector.broadcast %26 : vector<8x1xi1> to vector<8x1xi1>
    %28 = arith.xori %24, %27 : vector<8x1xi1>
    %29 = arith.andi %28, %22 : vector<8x1xi1>
    %30 = vector.broadcast %18 : i32 to vector<8x1xi32>
    %31 = arith.addi %20, %30 : vector<8x1xi32>
    %32 = arith.select %29, %31, %20 : vector<8x1xi1>, vector<8x1xi32>
    %c4_i32_10 = arith.constant 4 : i32
    %c0_i32_11 = arith.constant 0 : i32
    %33 = arith.cmpi eq, %c4_i32_10, %c0_i32_11 : i32
    %c1_i32_12 = arith.constant 1 : i32
    %34 = arith.select %33, %c1_i32_12, %c4_i32_10 : i32
    %35 = vector.broadcast %34 : i32 to vector<1x8xi32>
    %36 = arith.remsi %13, %35 : vector<1x8xi32>
    %c0_i32_13 = arith.constant 0 : i32
    %37 = vector.broadcast %c0_i32_13 : i32 to vector<1x8xi32>
    %38 = arith.cmpi ne, %36, %37 : vector<1x8xi32>
    %c0_i32_14 = arith.constant 0 : i32
    %39 = vector.broadcast %c0_i32_14 : i32 to vector<1x8xi32>
    %40 = arith.cmpi slt, %36, %39 : vector<1x8xi32>
    %c0_i32_15 = arith.constant 0 : i32
    %41 = arith.cmpi slt, %34, %c0_i32_15 : i32
    %42 = vector.broadcast %41 : i1 to vector<1x8xi1>
    %43 = vector.broadcast %42 : vector<1x8xi1> to vector<1x8xi1>
    %44 = arith.xori %40, %43 : vector<1x8xi1>
    %45 = arith.andi %44, %38 : vector<1x8xi1>
    %46 = vector.broadcast %34 : i32 to vector<1x8xi32>
    %47 = arith.addi %36, %46 : vector<1x8xi32>
    %48 = arith.select %45, %47, %36 : vector<1x8xi1>, vector<1x8xi32>
    %49 = vector.broadcast %32 : vector<8x1xi32> to vector<8x8xi32>
    %50 = vector.broadcast %48 : vector<1x8xi32> to vector<8x8xi32>
    %51 = arith.cmpi ne, %49, %50 : vector<8x8xi32>
    %52 = vector.broadcast %16 : vector<1x8xi1> to vector<8x8xi1>
    %53 = arith.andi %52, %51 : vector<8x8xi1>
    %cst_16 = arith.constant -1.000000e+30 : f32
    %54 = vector.broadcast %cst_16 : f32 to vector<8x8xf32>
    %55 = arith.select %53, %5, %54 : vector<8x8xi1>, vector<8x8xf32>
    %cst_17 = arith.constant dense<0xFF800000> : vector<8xf32>
    %56 = vector.multi_reduction <maximumf>, %55, %cst_17 [1] : vector<8x8xf32> to vector<8xf32>
    %57 = vector.shape_cast %56 : vector<8xf32> to vector<8x1xf32>
    %c0_18 = arith.constant 0 : index
    %c0_19 = arith.constant 0 : index
    %58 = vector.load %arg5[%c0_18, %c0_19] : memref<8x1xf32, #tpu.memory_space<vmem>>, vector<8x1xf32>
    %59 = arith.maximumf %58, %57 : vector<8x1xf32>
    %60 = arith.subf %58, %59 : vector<8x1xf32>
    %61 = math.exp %60 : vector<8x1xf32>
    %62 = vector.broadcast %59 : vector<8x1xf32> to vector<8x8xf32>
    %63 = arith.subf %5, %62 : vector<8x8xf32>
    %64 = math.exp %63 : vector<8x8xf32>
    %cst_20 = arith.constant 0.000000e+00 : f32
    %65 = vector.broadcast %cst_20 : f32 to vector<8x8xf32>
    %66 = arith.select %53, %64, %65 : vector<8x8xi1>, vector<8x8xf32>
    %c0_21 = arith.constant 0 : index
    %c0_22 = arith.constant 0 : index
    %67 = vector.load %arg6[%c0_21, %c0_22] : memref<8x1xf32, #tpu.memory_space<vmem>>, vector<8x1xf32>
    %68 = arith.mulf %61, %67 : vector<8x1xf32>
    %cst_23 = arith.constant dense<0.000000e+00> : vector<8xf32>
    %69 = vector.multi_reduction <add>, %66, %cst_23 [1] : vector<8x8xf32> to vector<8xf32>
    %70 = vector.shape_cast %69 : vector<8xf32> to vector<8x1xf32>
    %71 = arith.addf %68, %70 : vector<8x1xf32>
    %c0_24 = arith.constant 0 : index
    %c0_25 = arith.constant 0 : index
    %72 = vector.load %arg6[%c0_24, %c0_25] : memref<8x1xf32, #tpu.memory_space<vmem>>, vector<8x1xf32>
    tpu.vector_store %arg6[%c0_24, %c0_25], %71 {strides = array<i32>} : memref<8x1xf32, #tpu.memory_space<vmem>>, vector<8x1xf32>,
    %c0_26 = arith.constant 0 : index
    %c0_27 = arith.constant 0 : index
    %73 = vector.load %arg5[%c0_26, %c0_27] : memref<8x1xf32, #tpu.memory_space<vmem>>, vector<8x1xf32>
    tpu.vector_store %arg5[%c0_26, %c0_27], %59 {strides = array<i32>} : memref<8x1xf32, #tpu.memory_space<vmem>>, vector<8x1xf32>,
    %c8_i32_28 = arith.constant 8 : i32
    %74 = arith.muli %arg0, %c8_i32_28 : i32
    %c8_i32_29 = arith.constant 8 : i32
    %75 = arith.addi %74, %c8_i32_29 : i32
    %c8_i32_30 = arith.constant 8 : i32
    %76 = arith.minsi %75, %c8_i32_30 : i32
    %c8_i32_31 = arith.constant 8 : i32
    %77 = arith.muli %arg1, %c8_i32_31 : i32
    %c8_i32_32 = arith.constant 8 : i32
    %78 = arith.addi %77, %c8_i32_32 : i32
    %c8_i32_33 = arith.constant 8 : i32
    %79 = arith.minsi %78, %c8_i32_33 : i32
    %80 = arith.subi %79, %77 : i32
    %c4_i32_34 = arith.constant 4 : i32
    %81 = arith.subi %77, %c4_i32_34 : i32
    %c8_i32_35 = arith.constant 8 : i32
    %c0_i32_36 = arith.constant 0 : i32
    %82 = arith.cmpi eq, %c8_i32_35, %c0_i32_36 : i32
    %c1_i32_37 = arith.constant 1 : i32
    %83 = arith.select %82, %c1_i32_37, %c8_i32_35 : i32
    %84 = arith.remsi %81, %83 : i32
    %c0_i32_38 = arith.constant 0 : i32
    %85 = arith.cmpi ne, %84, %c0_i32_38 : i32
    %c0_i32_39 = arith.constant 0 : i32
    %86 = arith.cmpi slt, %84, %c0_i32_39 : i32
    %c0_i32_40 = arith.constant 0 : i32
    %87 = arith.cmpi slt, %83, %c0_i32_40 : i32
    %88 = arith.xori %86, %87 : i1
    %89 = arith.andi %88, %85 : i1
    %90 = arith.addi %84, %83 : i32
    %91 = arith.select %89, %90, %84 : i32
    %92 = arith.addi %91, %80 : i32
    %93 = arith.cmpi slt, %91, %76 : i32
    %c8_i32_41 = arith.constant 8 : i32
    %94 = arith.minsi %92, %c8_i32_41 : i32
    %95 = arith.cmpi sgt, %94, %74 : i32
    %96 = arith.andi %93, %95 : i1
    %c8_i32_42 = arith.constant 8 : i32
    %97 = arith.cmpi sgt, %92, %c8_i32_42 : i32
    %c8_i32_43 = arith.constant 8 : i32
    %98 = arith.subi %92, %c8_i32_43 : i32
    %99 = arith.cmpi sgt, %98, %74 : i32
    %100 = arith.andi %97, %99 : i1
    %101 = arith.ori %96, %100 : i1
    %102 = arith.extui %101 : i1 to i32
    %c0_i32_44 = arith.constant 0 : i32
    %103 = arith.cmpi ne, %102, %c0_i32_44 : i32
    scf.if %103 {
      %c4_i32_47 = arith.constant 4 : i32
      %107 = vector.broadcast %c4_i32_47 : i32 to vector<8x1xi32>
      %108 = arith.addi %9, %107 : vector<8x1xi32>
      %c8_i32_48 = arith.constant 8 : i32
      %c0_i32_49 = arith.constant 0 : i32
      %109 = arith.cmpi eq, %c8_i32_48, %c0_i32_49 : i32
      %c1_i32_50 = arith.constant 1 : i32
      %110 = arith.select %109, %c1_i32_50, %c8_i32_48 : i32
      %111 = vector.broadcast %110 : i32 to vector<8x1xi32>
      %112 = arith.remsi %108, %111 : vector<8x1xi32>
      %c0_i32_51 = arith.constant 0 : i32
      %113 = vector.broadcast %c0_i32_51 : i32 to vector<8x1xi32>
      %114 = arith.cmpi ne, %112, %113 : vector<8x1xi32>
      %c0_i32_52 = arith.constant 0 : i32
      %115 = vector.broadcast %c0_i32_52 : i32 to vector<8x1xi32>
      %116 = arith.cmpi slt, %112, %115 : vector<8x1xi32>
      %c0_i32_53 = arith.constant 0 : i32
      %117 = arith.cmpi slt, %110, %c0_i32_53 : i32
      %118 = vector.broadcast %117 : i1 to vector<8x1xi1>
      %119 = vector.broadcast %118 : vector<8x1xi1> to vector<8x1xi1>
      %120 = arith.xori %116, %119 : vector<8x1xi1>
      %121 = arith.andi %120, %114 : vector<8x1xi1>
      %122 = vector.broadcast %110 : i32 to vector<8x1xi32>
      %123 = arith.addi %112, %122 : vector<8x1xi32>
      %124 = arith.select %121, %123, %112 : vector<8x1xi1>, vector<8x1xi32>
      %125 = vector.broadcast %13 : vector<1x8xi32> to vector<8x8xi32>
      %126 = vector.broadcast %124 : vector<8x1xi32> to vector<8x8xi32>
      %127 = arith.cmpi eq, %125, %126 : vector<8x8xi32>
      %cst_54 = arith.constant 0.000000e+00 : f32
      %128 = vector.broadcast %cst_54 : f32 to vector<8x8xf32>
      %129 = arith.select %127, %5, %128 : vector<8x8xi1>, vector<8x8xf32>
      %cst_55 = arith.constant dense<0.000000e+00> : vector<8xf32>
      %130 = vector.multi_reduction <add>, %129, %cst_55 [1] : vector<8x8xf32> to vector<8xf32>
      %131 = vector.shape_cast %130 : vector<8xf32> to vector<8x1xf32>
      %c0_56 = arith.constant 0 : index
      %c0_57 = arith.constant 0 : index
      %132 = vector.load %arg7[%c0_56, %c0_57] : memref<8x128xf32, #tpu.memory_space<vmem>>, vector<8x128xf32>
      %c0_i32_58 = arith.constant 0 : i32
      %133 = vector.broadcast %c0_i32_58 : i32 to vector<1x128xi32>
      %134 = arith.cmpi eq, %14, %133 : vector<1x128xi32>
      %cst_59 = arith.constant 0.000000e+00 : f32
      %135 = vector.shape_cast %134 : vector<1x128xi1> to vector<1x128xi1>
      %136 = vector.broadcast %135 : vector<1x128xi1> to vector<8x128xi1>
      %137 = vector.shape_cast %131 : vector<8x1xf32> to vector<8x1xf32>
      %138 = vector.broadcast %137 : vector<8x1xf32> to vector<8x128xf32>
      %139 = vector.broadcast %cst_59 : f32 to vector<8x128xf32>
      %140 = arith.select %136, %138, %139 : vector<8x128xi1>, vector<8x128xf32>
      %141 = arith.addf %132, %140 : vector<8x128xf32>
      %c0_60 = arith.constant 0 : index
      %c0_61 = arith.constant 0 : index
      %142 = vector.load %arg7[%c0_60, %c0_61] : memref<8x128xf32, #tpu.memory_space<vmem>>, vector<8x128xf32>
      tpu.vector_store %arg7[%c0_60, %c0_61], %141 {strides = array<i32>} : memref<8x128xf32, #tpu.memory_space<vmem>>, vector<8x128xf32>,
    } else {
    }
    %c0_i32_45 = arith.constant 0 : i32
    %104 = arith.cmpi eq, %arg1, %c0_i32_45 : i32
    %105 = arith.extui %104 : i1 to i32
    %c0_i32_46 = arith.constant 0 : i32
    %106 = arith.cmpi ne, %105, %c0_i32_46 : i32
    scf.if %106 {
      %c8_i32_47 = arith.constant 8 : i32
      %107 = vector.broadcast %c8_i32_47 : i32 to vector<8x1xi32>
      %108 = arith.cmpi slt, %9, %107 : vector<8x1xi32>
      %c0_48 = arith.constant 0 : index
      %c0_49 = arith.constant 0 : index
      %109 = vector.load %arg5[%c0_48, %c0_49] : memref<8x1xf32, #tpu.memory_space<vmem>>, vector<8x1xf32>
      %c0_50 = arith.constant 0 : index
      %c0_51 = arith.constant 0 : index
      %110 = vector.load %arg6[%c0_50, %c0_51] : memref<8x1xf32, #tpu.memory_space<vmem>>, vector<8x1xf32>
      %111 = math.log %110 : vector<8x1xf32>
      %112 = arith.addf %109, %111 : vector<8x1xf32>
      %c0_52 = arith.constant 0 : index
      %c0_53 = arith.constant 0 : index
      %113 = vector.load %arg7[%c0_52, %c0_53] : memref<8x128xf32, #tpu.memory_space<vmem>>, vector<8x128xf32>
      %114 = vector.broadcast %112 : vector<8x1xf32> to vector<8x128xf32>
      %115 = arith.subf %114, %113 : vector<8x128xf32>
      %cst_54 = arith.constant 0.000000e+00 : f32
      %116 = vector.broadcast %cst_54 : f32 to vector<8x128xf32>
      %117 = arith.maximumf %115, %116 : vector<8x128xf32>
      %118 = math.absf %115 : vector<8x128xf32>
      %cst_55 = arith.constant 0.000000e+00 : f32
      %119 = vector.broadcast %cst_55 : f32 to vector<8x128xf32>
      %120 = arith.subf %119, %118 : vector<8x128xf32>
      %121 = math.exp %120 : vector<8x128xf32>
      %122 = math.log1p %121 : vector<8x128xf32>
      %123 = arith.addf %117, %122 : vector<8x128xf32>
      %c1_i32_56 = arith.constant 1 : i32
      %124 = vector.broadcast %c1_i32_56 : i32 to vector<1x128xi32>
      %125 = arith.cmpi slt, %14, %124 : vector<1x128xi32>
      %126 = vector.broadcast %108 : vector<8x1xi1> to vector<8x128xi1>
      %127 = vector.broadcast %125 : vector<1x128xi1> to vector<8x128xi1>
      %128 = arith.andi %126, %127 : vector<8x128xi1>
      %cst_57 = arith.constant 0.000000e+00 : f32
      %129 = vector.broadcast %cst_57 : f32 to vector<8x128xf32>
      %130 = arith.select %128, %123, %129 : vector<8x128xi1>, vector<8x128xf32>
      %131 = vector.shape_cast %130 : vector<8x128xf32> to vector<1x8x128xf32>
      %cst_58 = arith.constant dense<0.000000e+00> : vector<1xf32>
      %132 = vector.multi_reduction <add>, %131, %cst_58 [1, 2] : vector<1x8x128xf32> to vector<1xf32>
      %133 = vector.shape_cast %132 : vector<1xf32> to vector<1x1x1xf32>
      %134 = vector.extract %133[0, 0, 0] : f32 from vector<1x1x1xf32>
      %135 = tpu.iota {dimensions = array<i32: 0>} : vector<8x128xi32>
      %136 = tpu.iota {dimensions = array<i32: 1>} : vector<8x128xi32>
      %c0_i32_59 = arith.constant 0 : i32
      %137 = vector.broadcast %c0_i32_59 : i32 to vector<8x128xi32>
      %138 = arith.cmpi eq, %135, %137 : vector<8x128xi32>
      %c0_i32_60 = arith.constant 0 : i32
      %139 = vector.broadcast %c0_i32_60 : i32 to vector<8x128xi32>
      %140 = arith.cmpi eq, %136, %139 : vector<8x128xi32>
      %141 = arith.andi %138, %140 : vector<8x128xi1>
      %cst_61 = arith.constant 0.000000e+00 : f32
      %142 = vector.broadcast %134 : f32 to vector<8x128xf32>
      %143 = vector.broadcast %cst_61 : f32 to vector<8x128xf32>
      %144 = arith.select %141, %142, %143 : vector<8x128xi1>, vector<8x128xf32>
      %c0_62 = arith.constant 0 : index
      %c0_63 = arith.constant 0 : index
      %145 = vector.load %arg4[%c0_62, %c0_63] : memref<8x128xf32, #tpu.memory_space<vmem>>, vector<8x128xf32>
      tpu.vector_store %arg4[%c0_62, %c0_63], %144 {strides = array<i32>} : memref<8x128xf32, #tpu.memory_space<vmem>>, vector<8x128xf32>,
    } else {
    }
    return
  }
  func.func @transform_0(%arg0: i32, %arg1: i32) -> (i32, i32) {
    %c0_i32 = arith.constant 0 : i32
    %c0_i32_0 = arith.constant 0 : i32
    return %arg0, %c0_i32 : i32, i32
  }
  func.func @transform_1(%arg0: i32, %arg1: i32) -> (i32, i32) {
    %c0_i32 = arith.constant 0 : i32
    %c0_i32_0 = arith.constant 0 : i32
    return %arg1, %c0_i32 : i32, i32
  }
  func.func @transform_2(%arg0: i32, %arg1: i32) -> (i32, i32) {
    %c0_i32 = arith.constant 0 : i32
    %c0_i32_0 = arith.constant 0 : i32
    return %arg0, %c0_i32 : i32, i32
  }
}

</mosaic_0001>

<bundles_post_ra>
// kernel: tpu_custom_call.1
= control target key start
LH: loop header
LB: loop body
LE: loop exit
PB: predicated region body
PF: predicated region fallthrough
CT: control target
= control target key end

     0   :  { %7 = vsyncpa [#allocation6], 0  ;;  %s482_s0 = inlined_call_operand.hbm [shape: bf16[8,32], index: 0, kind: input, shape index: {}]   ;;  %s483_s1 = inlined_call_operand.hbm [shape: bf16[8,32], index: 1, kind: input, shape index: {}]   ;;  %s484_s2 = inlined_call_operand.hbm [shape: f32[8,128], index: 2, kind: output, shape index: {}]  }
   0x1   :  { %8 = vsyncpa [#allocation9], 0 }
   0x2   :  { %9 = vsyncpa [#allocation7], 0  ;;  %s393_s9 = smov [#allocation5]   ;;  %s394_s11 = smov [#allocation8]  }
   0x3   :  { %s16_s10 = sshll.u32 %s393_s9, 4  ;;  %s26_s12 = sshll.u32 %s394_s11, 4  ;;  %s17_s10 = int_to_ptr.vmem [resolvable:$true] %s16_s10  ;;  %s27_s12 = int_to_ptr.vmem [resolvable:$true] %s26_s12 }
   0x4   :  { %s321_s15 = scalar_lea.hbm %s482_s0, 64 }
   0x5   :  { %p322_p0 = scmp.ne.s32.totalorder %s482_s0, %s321_s15  ;;  %p325_p1 = scmp.lt.u32.totalorder %s321_s15, %s482_s0 }
   0x7   :  { %p327_p2 = pnand %p325_p1, %p322_p0 }
   0x9   :  { %330 = shalt.err (!%p327_p2)
}
   0xa   :  { %s331_s20 = scalar_lea.vmem %s17_s10, 64  ;;  %p336_p4 = scmp.lt.s32.totalorder %s17_s10, %s17_s10 }
   0xb   :  { %p332_p3 = scmp.ne.s32.totalorder %s17_s10, %s331_s20  ;;  %p337_p5 = scmp.lt.s32.totalorder %s331_s20, %s331_s20 }
   0xd   :  { %p338_p6 = por %p337_p5, %p336_p4 }
   0xf   :  { %p339_p7 = pnand %p338_p6, %p332_p3 }
  0x11   :  { %342 = shalt.err (!%p339_p7)
}
  0x12   :  { %19 = dma.hbm_to_vmem [thread:$0]  %s482_s0, 64, %s17_s10, [#allocation6]  }
  0x13   :  { %s343_s25 = scalar_lea.hbm %s483_s1, 64 }
  0x14   :  { %p344_p8 = scmp.ne.s32.totalorder %s483_s1, %s343_s25  ;;  %p347_p9 = scmp.lt.u32.totalorder %s343_s25, %s483_s1 }
  0x16   :  { %p349_p10 = pnand %p347_p9, %p344_p8 }
  0x18   :  { %352 = shalt.err (!%p349_p10)
}
  0x19   :  { %s353_s30 = scalar_lea.vmem %s27_s12, 64  ;;  %p358_p12 = scmp.lt.s32.totalorder %s27_s12, %s27_s12 }
  0x1a   :  { %p354_p11 = scmp.ne.s32.totalorder %s27_s12, %s353_s30  ;;  %p359_p13 = scmp.lt.s32.totalorder %s353_s30, %s353_s30 }
  0x1c   :  { %p360_p0 = por %p359_p13, %p358_p12 }
  0x1e   :  { %p361_p1 = pnand %p360_p0, %p354_p11 }
  0x20   :  { %364 = shalt.err (!%p361_p1)
}
  0x21   :  { %29 = dma.hbm_to_vmem [thread:$0]  %s483_s1, 64, %s27_s12, [#allocation9]  }
  0x22   :  { %387 = dma.done.wait [#allocation6], 64  }
  0x23   :  { %388 = vsyncadd [#allocation6], 4294967232 }
  0x24   :  { %389 = dma.done.wait [#allocation9], 64  }
  0x25   :  { %390 = vsyncadd [#allocation9], 4294967232  ;;  %vm41_vm0 = vcmask 7168   ;;  %v395_v0 = vmov -1e+30   ;;  %v396_v1 = vmov 0.0   ;;  %v95_v5 = vlaneseq }
  0x26   :  { %42 = vst.msk [vmem:[#allocation2] sm:$0xff] %vm41_vm0, %v395_v0  ;;  %43 = vst.msk [vmem:[#allocation3] sm:$0xff] %vm41_vm0, %v396_v1  ;;  %294 = vmatprep.subr.bf16.mxu0 %v396_v1  ;;  %vm397_vm1 = vmmov 0   ;;  %vm47_vm2 = vcmask 261120   ;;  %v46_v2 = vld [vmem:[#allocation8] sm:$0xf] }
  0x27   :  { %296 = vmatprep.mubr.msk.bf16.mxu0 %vm397_vm1, %v396_v1  ;;  %v52_v3 = vsel %vm47_vm2, %v46_v2, 0  ;;  %v45_v4 = vld [vmem:[#allocation5] sm:$0xf]  ;;  %v441_v6 = vshrl.u32 %v95_v5, 7  ;;  %v443_v7 = vand.u32 127, %v95_v5  ;;  %vm134_vm6 = vcmask 64512  }
  0x28   :  { %295 = vmatpush3.bf16.xpose.msra.mxu0 %v52_v3  ;;  %v398_v17 = vmov 0   ;;  %s399_s1 = smov [#allocation10]  }
  0x29   :  { %v109_v8 = vand.u32 3, %v441_v6  ;;  %v121_v9 = vand.u32 3, %v443_v7  ;;  %vm104_vm3 = vcmp.lt.s32.totalorder %v443_v7, 8  ;;  %309 = vset.pattern.permute.xlu0 %v398_v17  ;;  %310 = vset.pattern.permute.xlu1 %v398_v17  ;;  %v197_v25 = vadd.s32 4, %v441_v6  ;;  %s281_s4 = sshll.u32 %s399_s1, 4  ;;  %s282_s4 = int_to_ptr.vmem [resolvable:$true] %s281_s4 }
  0x2a   :  { %vm216_vm8 = vcmp.eq.s32.totalorder %v443_v7, 0  ;;  %vm253_vm10 = vcmp.lt.s32.totalorder %v443_v7, 1  ;;  %vm269_vm11 = vcmp.eq.s32.totalorder %v441_v6, 0  ;;  %s365_s6 = scalar_lea.vmem %s282_s4, 128  ;;  %p370_p3 = scmp.lt.s32.totalorder %s282_s4, %s282_s4 }
  0x2b   :  { %vm129_vm4 = vcmp.ne.s32.totalorder %v109_v8, %v121_v9  ;;  %v202_v26 = vand.u32 7, %v197_v25  ;;  %vm271_vm12 = vmand %vm269_vm11, %vm216_vm8  ;;  %p366_p2 = scmp.ne.s32.totalorder %s282_s4, %s365_s6  ;;  %p371_p4 = scmp.lt.s32.totalorder %s365_s6, %s365_s6 }
  0x2c   :  { %vm448_vm5 = vmand %vm104_vm3, %vm129_vm4 }
  0x2d   :  { %v138_v18 = vld [vmem:[#allocation2] sm:$0xff]  ;;  %vm210_vm7 = vcmp.eq.s32.totalorder %v443_v7, %v202_v26  ;;  %v152_v34 = vld [vmem:[#allocation3] sm:$0xff]  ;;  %p372_p5 = por %p371_p4, %p370_p3 }
  0x2f   :  { %297 = vmatmul.mubr.msk.bf16.vlgmr.msra.gmra.mrb[0].mxu0 %vm47_vm2, %v45_v4  ;;  %p373_p6 = pnand %p372_p5, %p366_p2 }
 0x102   :  { %v88_v11 = vpop.f32.mrb[0].mxu0 }
 0x103   :  { %v298_v12 = vpop.f32.mrb[1].mxu0  ;;  %v133_v13 = vsel %vm448_vm5, %v88_v11, -1e+30  ;;  %v211_v30 = vsel %vm210_vm7, %v88_v11, 0.0 }
 0x104   :  { %v91_v14 = vpop.f32.mrb[2].mxu0  ;;  %v135_v15 = vsel %vm134_vm6, %v133_v13, -inf  ;;  %v212_v31 = vsel %vm134_vm6, %v211_v30, 0.0 }
 0x105   :  { %136 = vmax.xlane.f32.xlu0 %v135_v15  ;;  %v299_v16 = vpop.f32.mrb[3].mxu0 }
 0x192   :  { %v137_v19 = vpop.xlane.xlu0 %136 }
 0x193   :  { %v139_v20 = vmax.f32 %v138_v18, %v137_v19 }
 0x195   :  { %v140_v21 = vsub.f32 %v138_v18, %v139_v20  ;;  %160 = vst.msk [vmem:[#allocation2] sm:$0xff] %vm41_vm0, %v139_v20  ;;  %145 = vperm.xlu0 %309, %v139_v20  }
 0x197   :  { %v141_v32 = vmul.f32 1.442695, %v140_v21 }
 0x19c   :  { %v226_v41 = vld [vmem:[#allocation2] sm:$0xff] }
 0x214   :  { %v146_v22 = vpop.permute.xlu0 %145 }
 0x215   :  { %v148_v23 = vsub.f32 %v88_v11, %v146_v22 }
 0x217   :  { %v149_v24 = vmul.f32 1.442695, %v148_v23 }
 0x219   :  { %311 = vpow2.f32 %v149_v24 }
 0x21a   :  { %313 = vpow2.f32 %v141_v32 }
 0x223   :  { %v312_v27 = vpop.eup %311 }
 0x224   :  { %v151_v28 = vsel %vm448_vm5, %v312_v27, 0.0  ;;  %v314_v33 = vpop.eup %313 }
 0x225   :  { %v154_v29 = vsel %vm134_vm6, %v151_v28, 0.0  ;;  %v153_v35 = vmul.f32 %v314_v33, %v152_v34 }
 0x226   :  { %155 = vadd.xlane.f32.xlu1 %v154_v29 }
 0x22a   :  { %213 = vadd.xlane.f32.xlu1 %v212_v31 }
 0x2b3   :  { %v156_v36 = vpop.xlane.xlu1 %155 }
 0x2b4   :  { %v157_v37 = vadd.f32 %v156_v36, %v153_v35 }
 0x2b6   :  { %159 = vst.msk [vmem:[#allocation3] sm:$0xff] %vm41_vm0, %v157_v37 }
 0x2b7   :  { %v214_v43 = vpop.xlane.xlu1 %213 }
 0x2b8   :  { %v219_v44 = vsel %vm216_vm8, %v214_v43, 0.0 }
 0x2bd   :  { %v227_v38 = vld [vmem:[#allocation3] sm:$0xff] }
 0x2be   :  { %315 = vlog2.f32 %v227_v38 }
 0x2c8   :  { %v316_v39 = vpop.eup %315 }
 0x2c9   :  { %v229_v40 = vmul.f32 0.6931472, %v316_v39 }
 0x2cb   :  { %v230_v42 = vadd.f32 %v229_v40, %v226_v41 }
 0x2cd   :  { %234 = vperm.xlu1 %310, %v230_v42  }
 0x34c   :  { %v235_v45 = vpop.permute.xlu1 %234 }
 0x34d   :  { %v237_v46 = vsub.f32 %v235_v45, %v219_v44 }
 0x34f   :  { %v239_v47 = vand.u32 2147483647, %v237_v46  ;;  %v238_v58 = vmax.f32 %v237_v46, 0.0 }
 0x351   :  { %v240_v48 = vsub.f32 0.0, %v239_v47 }
 0x353   :  { %v241_v49 = vmul.f32 1.442695, %v240_v48 }
 0x355   :  { %317 = vpow2.f32 %v241_v49 }
 0x35f   :  { %v318_v50 = vpop.eup %317 }
 0x360   :  { %v243_v51 = vadd.f32 1.0, %v318_v50  ;;  %v246_v52 = vmul.f32 -0.5, %v318_v50  ;;  %v249_v54 = vand.u32 2147483647, %v318_v50 }
 0x362   :  { %319 = vlog2.f32 %v243_v51  ;;  %v247_v53 = vadd.f32 1.0, %v246_v52  ;;  %vm250_vm9 = vcmp.lt.f32.partialorder %v249_v54, 0.0004427343 }
 0x364   :  { %v248_v57 = vmul.f32 %v318_v50, %v247_v53 }
 0x36c   :  { %v320_v55 = vpop.eup %319 }
 0x36d   :  { %v245_v56 = vmul.f32 0.6931472, %v320_v55 }
 0x36f   :  { %v251_v59 = vsel %vm250_vm9, %v248_v57, %v245_v56 }
 0x370   :  { %v252_v60 = vadd.f32 %v251_v59, %v238_v58 }
 0x372   :  { %v259_v61 = vsel %vm253_vm10, %v252_v60, 0.0 }
 0x373   :  { %260 = vadd.xlane.f32.xlu1 %v259_v61 }
 0x400   :  { %v261_v62 = vpop.xlane.xlu1 %260 }
 0x401   :  { %v262_v63 = vrot.slane %v261_v62, 4 }
 0x403   :  { %v263_v0 = vadd.f32 %v262_v63, %v261_v62 }
 0x405   :  { %v264_v1 = vrot.slane %v263_v0, 2 }
 0x407   :  { %v265_v2 = vadd.f32 %v264_v1, %v263_v0 }
 0x409   :  { %v266_v3 = vrot.slane %v265_v2, 1 }
 0x40b   :  { %v267_v4 = vadd.f32 %v266_v3, %v265_v2 }
 0x40d   :  { %300 = vpush %v267_v4 }
 0x43e   :  { %s301_s5 = spop %300 }
 0x43f   :  { %v272_v5 = vstv %s301_s5 }
 0x440   :  { %v273_v8 = vsel %vm271_vm12, %v272_v5, 0.0 }
 0x441   :  { %274 = vst [vmem:[#allocation10] sm:$0xff] %v273_v8 }
 0x442   :  { %376 = shalt.err (!%p373_p6)
}
 0x443   :  { %s377_s9 = scalar_lea.hbm %s484_s2, 128 }
 0x444   :  { %p378_p7 = scmp.ne.s32.totalorder %s484_s2, %s377_s9  ;;  %p381_p8 = scmp.lt.u32.totalorder %s377_s9, %s484_s2 }
 0x446   :  { %p383_p9 = pnand %p381_p8, %p378_p7 }
 0x448   :  { %386 = shalt.err (!%p383_p9)
}
 0x449   :  { %284 = dma.vmem_to_hbm [thread:$0]  %s282_s4, 128, %s484_s2, [#allocation7]  }
 0x44a   :  { %391 = dma.done.wait [#allocation7], 128  }
 0x44b   :  { %392 = vsyncadd [#allocation7], 4294967168 }
 0x44c   :  { %288 = vsyncpa [#allocation6], 1 }
 0x44d   :  { %289 = vsyncpa [#allocation9], 1 }
 0x44e   :  { %290 = vsyncpa [#allocation7], 1 }

</bundles_post_ra>
